<compile_context>
chip_gen: v6e
topology: v6e:2x2x1
jax: 0.10.0
libtpu: 0.0.40
codegen_flags: <defaults>
</compile_context>

<pallas_src>
import functools
import math

import jax
import jax.numpy as jnp
from jax import lax
from jax.experimental import pallas as pl
from jax.experimental.pallas import tpu as pltpu


def _pos_enc_2d_kernel(x_ref, out_ref, *, C, H, W):
    # x_ref / out_ref: (Bt, C, H*W). PE depends only on (channel, spatial), so it is
    # computed once as a (C, H*W) slab and broadcast over the Bt images in the block.
    HW = H * W

    # Flattened spatial index (lanes) -> (h, w). f32 floor-div + one-step correction
    # keeps this exact for any W (H*W < 2^24), using only VPU ops.
    sp = lax.broadcasted_iota(jnp.int32, (1, HW), 1).astype(jnp.float32)
    h = jnp.floor(sp / W)
    w = sp - h * W
    h = jnp.where(w >= W, h + 1.0, jnp.where(w < 0.0, h - 1.0, h))
    w = sp - h * W                                               # (1, HW)

    # Per-channel frequency / phase on a (C, 1) column (lane-constant -> tiny EUP cost).
    ch = lax.broadcasted_iota(jnp.int32, (C, 1), 0).astype(jnp.float32)
    k = jnp.floor(ch * 0.5)                                      # pair index c // 2
    parity = ch - 2.0 * k                                        # 0 for even c, 1 for odd c
    inv_freq = jnp.exp(k * (-2.0 * math.log(10000.0) / C))       # d_k, (C, 1)
    phase = parity * (math.pi / 2.0)                             # cos(t) = sin(t + pi/2)

    # 2 transcendentals per PE element (was 4 sin/cos + selects with jnp.where).
    pe = jnp.sin(h * inv_freq + phase) + jnp.sin(w * inv_freq + phase)   # (C, HW) f32

    out_ref[...] = (x_ref[...].astype(jnp.float32) + pe[None]).astype(out_ref.dtype)


def positional_encoding_2d_pallas(x, *, target_block_bytes=1 << 20):
    """x: (B, C, H, W) (NCHW, as in PyTorch). Returns the same shape/dtype."""
    B, C, H, W = x.shape
    if C % 2 != 0:
        raise ValueError("hidden_dim (C) must be even, as the PyTorch module requires.")
    HW = H * W
    x_flat = x.reshape(B, C, HW)                 # free reshape, no transpose

    # Images per grid step: largest divisor of B with block <= ~target_block_bytes,
    # but keep >= 2 grid steps when B >= 2 so v7x's two TensorCores are both used.
    itemsize = jnp.dtype(x.dtype).itemsize
    bytes_per_image = C * HW * itemsize
    max_bt = max(1, target_block_bytes // bytes_per_image)
    if B >= 2:
        max_bt = min(max_bt, B // 2)
    bt = max(d for d in range(1, B + 1) if B % d == 0 and d <= max_bt)
    # TODO(synk): for extreme C*H*W (single-image block >> a few MiB) add a second
    # lane-dense grid axis tiling H*W in multiples of 128.

    kernel = functools.partial(_pos_enc_2d_kernel, C=C, H=H, W=W)

    out_flat = pl.pallas_call(
        kernel,
        out_shape=jax.ShapeDtypeStruct((B, C, HW), x.dtype),
        grid_spec=pltpu.PrefetchScalarGridSpec(
            num_scalar_prefetch=0,
            grid=(B // bt,),
            in_specs=[pl.BlockSpec((bt, C, HW), lambda b: (b, 0, 0))],
            out_specs=pl.BlockSpec((bt, C, HW), lambda b: (b, 0, 0)),
        ),
        compiler_params=pltpu.CompilerParams(
            dimension_semantics=("parallel",)),
    )(x_flat)

    return out_flat.reshape(B, C, H, W)


def positional_encoding_2d_reference(x):
    """Pure-JAX mirror of the PyTorch forward."""
    B, C, H, W = x.shape
    y = jnp.arange(H, dtype=jnp.float32)
    xp = jnp.arange(W, dtype=jnp.float32)
    div_term = jnp.exp(jnp.arange(0, C, 2, dtype=jnp.float32)
                       * -(math.log(10000.0) / C))             # (C//2,)
    ang_y = y[None, :, None] * div_term[:, None, None]         # (C//2, H, 1)
    ang_x = xp[None, None, :] * div_term[:, None, None]        # (C//2, 1, W)
    pe_even = jnp.sin(ang_y) + jnp.sin(ang_x)                  # (C//2, H, W)
    pe_odd = jnp.cos(ang_y) + jnp.cos(ang_x)                   # (C//2, H, W)
    pe = jnp.zeros((C, H, W), jnp.float32)
    pe = pe.at[0::2].set(pe_even)
    pe = pe.at[1::2].set(pe_odd)
    return (x.astype(jnp.float32) + pe[None]).astype(x.dtype)


if __name__ == "__main__":
    # hidden_dim (C) = 4, batch = 2, spatial = 16x16
    B, C, H, W = 2, 4, 16, 16
    key = jax.random.PRNGKey(0)
    x = jax.random.normal(key, (B, C, H, W), jnp.float32)

    out = jax.block_until_ready(positional_encoding_2d_pallas(x))

    ref = positional_encoding_2d_reference(x)
    assert out.shape == (B, C, H, W)
    assert out.dtype == x.dtype
    assert jnp.max(jnp.abs(out - ref)) < 1e-4

    print("KERNEL_OK")
</pallas_src>

<mosaic_0001>
module attributes {stable_mosaic.version = 11 : i64} {
  func.func @_pos_enc_2d_kernel(%arg0: i32, %arg1: memref<1x4x256xf32, #tpu.memory_space<vmem>>, %arg2: memref<1x4x256xf32, #tpu.memory_space<vmem>>) attributes {dimension_semantics = [#tpu.dimension_semantics<parallel>], iteration_bounds = array<i64: 2>, scalar_prefetch = 0 : i64, scratch_operands = 0 : i64, tpu.core_type = #tpu.core_type<tc>, window_params = [{transform_indices = @transform_0, window_bounds = array<i64: 1, 4, 256>}, {transform_indices = @transform_1, window_bounds = array<i64: 1, 4, 256>}]} {
    %0 = tpu.iota {dimensions = array<i32: 1>} : vector<1x256xi32>
    %1 = arith.sitofp %0 : vector<1x256xi32> to vector<1x256xf32>
    %cst = arith.constant 1.600000e+01 : f32
    %2 = vector.broadcast %cst : f32 to vector<1x256xf32>
    %3 = arith.divf %1, %2 : vector<1x256xf32>
    %4 = math.floor %3 : vector<1x256xf32>
    %cst_0 = arith.constant 1.600000e+01 : f32
    %5 = vector.broadcast %cst_0 : f32 to vector<1x256xf32>
    %6 = arith.mulf %4, %5 : vector<1x256xf32>
    %7 = arith.subf %1, %6 : vector<1x256xf32>
    %cst_1 = arith.constant 1.600000e+01 : f32
    %8 = vector.broadcast %cst_1 : f32 to vector<1x256xf32>
    %9 = arith.cmpf oge, %7, %8 : vector<1x256xf32>
    %cst_2 = arith.constant 1.000000e+00 : f32
    %10 = vector.broadcast %cst_2 : f32 to vector<1x256xf32>
    %11 = arith.addf %4, %10 : vector<1x256xf32>
    %cst_3 = arith.constant 0.000000e+00 : f32
    %12 = vector.broadcast %cst_3 : f32 to vector<1x256xf32>
    %13 = arith.cmpf olt, %7, %12 : vector<1x256xf32>
    %cst_4 = arith.constant 1.000000e+00 : f32
    %14 = vector.broadcast %cst_4 : f32 to vector<1x256xf32>
    %15 = arith.subf %4, %14 : vector<1x256xf32>
    %16 = arith.select %13, %15, %4 : vector<1x256xi1>, vector<1x256xf32>
    %17 = arith.select %9, %11, %16 : vector<1x256xi1>, vector<1x256xf32>
    %cst_5 = arith.constant 1.600000e+01 : f32
    %18 = vector.broadcast %cst_5 : f32 to vector<1x256xf32>
    %19 = arith.mulf %17, %18 : vector<1x256xf32>
    %20 = arith.subf %1, %19 : vector<1x256xf32>
    %21 = tpu.iota {dimensions = array<i32: 0>} : vector<4x1xi32>
    %22 = arith.sitofp %21 : vector<4x1xi32> to vector<4x1xf32>
    %cst_6 = arith.constant 5.000000e-01 : f32
    %23 = vector.broadcast %cst_6 : f32 to vector<4x1xf32>
    %24 = arith.mulf %22, %23 : vector<4x1xf32>
    %25 = math.floor %24 : vector<4x1xf32>
    %cst_7 = arith.constant 2.000000e+00 : f32
    %26 = vector.broadcast %cst_7 : f32 to vector<4x1xf32>
    %27 = arith.mulf %26, %25 : vector<4x1xf32>
    %28 = arith.subf %22, %27 : vector<4x1xf32>
    %cst_8 = arith.constant -4.60517025 : f32
    %29 = vector.broadcast %cst_8 : f32 to vector<4x1xf32>
    %30 = arith.mulf %25, %29 : vector<4x1xf32>
    %31 = math.exp %30 : vector<4x1xf32>
    %cst_9 = arith.constant 1.57079637 : f32
    %32 = vector.broadcast %cst_9 : f32 to vector<4x1xf32>
    %33 = arith.mulf %28, %32 : vector<4x1xf32>
    %34 = vector.broadcast %17 : vector<1x256xf32> to vector<4x256xf32>
    %35 = vector.broadcast %31 : vector<4x1xf32> to vector<4x256xf32>
    %36 = arith.mulf %34, %35 : vector<4x256xf32>
    %37 = vector.broadcast %33 : vector<4x1xf32> to vector<4x256xf32>
    %38 = arith.addf %36, %37 : vector<4x256xf32>
    %39 = math.sin %38 : vector<4x256xf32>
    %40 = vector.broadcast %20 : vector<1x256xf32> to vector<4x256xf32>
    %41 = vector.broadcast %31 : vector<4x1xf32> to vector<4x256xf32>
    %42 = arith.mulf %40, %41 : vector<4x256xf32>
    %43 = vector.broadcast %33 : vector<4x1xf32> to vector<4x256xf32>
    %44 = arith.addf %42, %43 : vector<4x256xf32>
    %45 = math.sin %44 : vector<4x256xf32>
    %46 = arith.addf %39, %45 : vector<4x256xf32>
    %c0 = arith.constant 0 : index
    %c0_10 = arith.constant 0 : index
    %c0_11 = arith.constant 0 : index
    %47 = vector.load %arg1[%c0, %c0_10, %c0_11] : memref<1x4x256xf32, #tpu.memory_space<vmem>>, vector<1x4x256xf32>
    %48 = vector.shape_cast %46 : vector<4x256xf32> to vector<1x4x256xf32>
    %49 = arith.addf %47, %48 : vector<1x4x256xf32>
    %c0_12 = arith.constant 0 : index
    %c0_13 = arith.constant 0 : index
    %c0_14 = arith.constant 0 : index
    %50 = vector.load %arg2[%c0_12, %c0_13, %c0_14] : memref<1x4x256xf32, #tpu.memory_space<vmem>>, vector<1x4x256xf32>
    tpu.vector_store %arg2[%c0_12, %c0_13, %c0_14], %49 {strides = array<i32>} : memref<1x4x256xf32, #tpu.memory_space<vmem>>, vector<1x4x256xf32>,
    return
  }
  func.func @transform_0(%arg0: i32) -> (i32, i32, i32) {
    %c0_i32 = arith.constant 0 : i32
    %c0_i32_0 = arith.constant 0 : i32
    %c0_i32_1 = arith.constant 0 : i32
    return %arg0, %c0_i32, %c0_i32_0 : i32, i32, i32
  }
  func.func @transform_1(%arg0: i32) -> (i32, i32, i32) {
    %c0_i32 = arith.constant 0 : i32
    %c0_i32_0 = arith.constant 0 : i32
    %c0_i32_1 = arith.constant 0 : i32
    return %arg0, %c0_i32, %c0_i32_0 : i32, i32, i32
  }
}

</mosaic_0001>

<bundles_post_ra>
// kernel: tpu_custom_call.1
= control target key start
LH: loop header
LB: loop body
LE: loop exit
PB: predicated region body
PF: predicated region fallthrough
CT: control target
= control target key end

     0   :  { %6 = vsyncpa [#allocation3], 0  ;;  %s1362_s0 = inlined_call_operand.hbm [shape: f32[2,4,256], index: 0, kind: input, shape index: {}]   ;;  %s1363_s1 = inlined_call_operand.hbm [shape: f32[2,4,256], index: 1, kind: output, shape index: {}]  }
   0x1   :  { %8 = vsyncpa [#allocation3 + $0x1], 0 }
   0x2   :  { %9 = vsyncpa [#allocation4], 0 }
   0x3   :  { %11 = vsyncpa [#allocation4 + $0x1], 0  ;;  %s924_s6 = smov 0   ;;  %s926_s7 = smov 0  }
   0x4   :  { %s928_s8 = smov 0   ;;  %s930_s9 = smov 0  }
   0x5 LB: > { %s945_s10 = sadd.s32 4294967295, %s904_s9   ;;  %s692_s11 = sadd.s32 4294967294, %s904_s9   ;;  %s904_s9 = sphi %s930_s9, %s1388_s9   ;;  %s900_s8 = sphi %s928_s8, %s1387_s8   ;;  %s896_s7 = sphi %s926_s7, %s1386_s7   ;;  %s892_s6 = sphi %s924_s6, %s1385_s6  }
   0x6   : > { %s949_s12 = sadd.s32 1, %s904_s9   ;;  %s24_s13 = sadd.s32 1, %s900_s8 }
   0x7   : > { %s21_s14 = ssub.s32 %s904_s9, %s949_s12  ;;  %p31_p0 = scmp.ne.s32.totalorder %s900_s8, %s896_s7 }
   0x8   : > { %p22_p1 = scmp.eq.s32.totalorder %s21_s14, 0  ;;  %p32_p2 = scmp.eq.s32.totalorder %s904_s9, 0 }
   0x9   : > { %p37_p3 = scmp.ne.s32.totalorder %s896_s7, %s892_s6  ;;  %p38_p4 = scmp.eq.s32.totalorder %s945_s10, 0 }
   0xa   : > { %s961_s15 = scalar_select %p22_p1, %s900_s8, %s24_s13  }
   0xb   : > { %p963_p5 = por %p32_p2, %p31_p0  ;;  %p967_p6 = por %p38_p4, %p37_p3 }
   0xc   : > { %p61_p7 = scmp.eq.s32.totalorder %s945_s10, 1  ;;  %p67_p8 = scmp.eq.s32.totalorder %s692_s11, 1 }
   0xd   : > { %s1367_s17 = scalar_select %p967_p6, 1, 0 }
   0xe   : > { %p754_p10 = scmp.lt.s32.totalorder %s904_s9, 2  ;;  %p974_p11 = por %p61_p7, %p31_p0 }
   0xf   : > { %p978_p12 = por %p67_p8, %p37_p3  ;;  %s87_s20 = sand.u32 1, %s900_s8  }
  0x10   : > { %s1368_s18 = scalar_select %p974_p11, 1, 0 }
  0x11   : > { %s1369_s19 = scalar_select %p978_p12, 1, 0 }
  0x12   : > { %s724_s21 = sshll.u32 %s904_s9, 7  ;;  %s695_s22 = sshll.u32 %s87_s20, 3 }
  0x13   : > { %s987_s25 = scalar_lea.hbm %s1362_s0, %s724_s21  ;;  %s91_s26 = scalar_lea.vmem [#allocation2], %s695_s22 }
  0x14   : > { %s99_s27 = sshll.u32 %s91_s26, 4  ;;  %p991_p13 = pnand %p754_p10, %p963_p5  ;;  %s995_s27 = int_to_ptr.vmem [resolvable:$true] %s99_s27 }
  0x15   : > { %s88_s29 = scalar_lea.sflag [#allocation3], %s87_s20  ;;  %s812_s30 = scalar_lea.hbm %s987_s25, 128 }
  0x16   : > { %p813_p2 = scmp.ne.s32.totalorder %s987_s25, %s812_s30  ;;  %p814_p3 = pneg %p991_p13 }
  0x17   : > { %s817_s4 = scalar_lea.hbm %s1362_s0, 256  ;;  %p818_p5 = scmp.lt.s32.totalorder %s987_s25, %s1362_s0 }
  0x18   : > { %p815_p4 = pnand %p814_p3, %p813_p2  ;;  %p819_p8 = scmp.lt.s32.totalorder %s817_s4, %s812_s30 }
  0x1a   : > { %p816_p7 = pneg %p815_p4  ;;  %p820_p10 = por %p819_p8, %p818_p5 }
  0x1c   : > { %p821_p9 = pnand %p820_p10, %p816_p7 }
  0x1e   : > { %824 = shalt.err (!%p821_p9)
}
  0x1f   : > { %s825_s13 = scalar_lea.vmem %s995_s27, 128  ;;  %s906_s14 = smov [#allocation2]  }
  0x20   : > { %p826_p0 = scmp.ne.s32.totalorder %s995_s27, %s825_s13  ;;  %s830_s16 = sshll.u32 %s906_s14, 4  ;;  %s831_s16 = int_to_ptr.vmem [resolvable:$false] %s830_s16 }
  0x21   : > { %s832_s20 = scalar_lea.vmem %s831_s16, 256  ;;  %p833_p4 = scmp.lt.s32.totalorder %s995_s27, %s831_s16 }
  0x22   : > { %p828_p1 = pnand %p826_p0, %p814_p3  ;;  %p834_p12 = scmp.lt.s32.totalorder %s832_s20, %s825_s13 }
  0x24   : > { %p829_p2 = pneg %p828_p1  ;;  %p835_p11 = por %p834_p12, %p833_p4 }
  0x26   : > { %p836_p6 = pnand %p835_p11, %p829_p2 }
  0x28   : > { %839 = shalt.err (!%p836_p6)
}
  0x29   : > { %749 = dma.hbm_to_vmem [thread:$0]  (!%p991_p13), %s987_s25, 128, %s995_s27, %s88_s29  }
  0x2a   : > { %p1371_p9 = scmp.lt.s32.totalorder %s904_s9, 3  ;;  %p1372_p7 = scmp.ge.s32.totalorder %s904_s9, 1 }
  0x2c   : > { %p105_p0 = pnand %p1372_p7, %p1371_p9 }
  0x2d   : > { %s1022_s21 = sand.u32 (!%p105_p0), 1, %s896_s7   ;;  %p1373_p6 = scmp.ne.s32.totalorder (!%p105_p0), %s1367_s17, 0 }
  0x2e   : > { %108 = sbr.rel (%p105_p0) target bundleno = 229 (0xe5), region = 24  ;;  %s699_s22 = sshll.u32 (!%p105_p0), %s1022_s21, 3 }
  0x2f   : > { %s111_s23 = scalar_lea.sflag (!%p105_p0), [#allocation3], %s1022_s21  ;;  %s1028_s24 = scalar_lea.vmem (!%p105_p0), [#allocation2], %s699_s22 }
  0x33   : > { %883 = dma.done.wait (%p1373_p6), %s111_s23, 128  }
  0x34   : > { %885 = vsyncadd (%p1373_p6), %s111_s23, 4294967168  ;;  %v133_v0 = vlaneseq  ;;  %s725_s17 = sshll.u32 %s945_s10, 7  ;;  %s132_s25 = scalar_lea.vmem [#allocation5], %s699_s22 }
  0x35   : > { %s622_s26 = sshll.u32 %s132_s25, 4  ;;  %s620_s29 = scalar_lea.hbm %s1363_s1, %s725_s17  ;;  %s623_s26 = int_to_ptr.vmem [resolvable:$true] %s622_s26 }
  0x36   : > { %v134_v1 = vand.u32 127, %v133_v0  ;;  %v164_v2 = vshrl.u32 %v133_v0, 7  ;;  %s608_s30 = scalar_lea.sflag [#allocation4], %s1022_s21  ;;  %s840_s2 = scalar_lea.vmem %s623_s26, 128 }
  0x37   : > { %p841_p11 = scmp.ne.s32.totalorder %s623_s26, %s840_s2  ;;  %p1382_p12 = scmp.ne.s32.totalorder %s1368_s18, 0 }
  0x38   : > { %v135_v3 = vadd.s32 128, %v134_v1  ;;  %v136_v4 = vcvt.s32.f32 %v134_v1  ;;  %v165_v5 = vcvt.s32.f32 %v164_v2  ;;  %s913_s3 = smov [#allocation5]  }
  0x39   : > { %p842_p13 = pnand %p841_p11, %p1382_p12  ;;  %s844_s4 = sshll.u32 %s913_s3, 4  ;;  %s845_s4 = int_to_ptr.vmem [resolvable:$false] %s844_s4 }
  0x3a   : > { %v1034_v6 = vcvt.s32.f32 %v135_v3  ;;  %v139_v7 = vmul.f32 0.0625, %v136_v4  ;;  %v166_v8 = vmul.f32 0.5, %v165_v5  ;;  %v907_v3 = vmov 683565275   ;;  %s846_s10 = scalar_lea.vmem %s845_s4, 256  ;;  %p847_p3 = scmp.lt.s32.totalorder %s623_s26, %s845_s4 }
  0x3b   : > { %p843_p1 = pneg %p842_p13  ;;  %p848_p5 = scmp.lt.s32.totalorder %s846_s10, %s840_s2 }
  0x3c   : > { %v140_v9 = vmul.f32 0.0625, %v1034_v6  ;;  %v141_v10 = vfloor.f32 %v139_v7  ;;  %v167_v11 = vfloor.f32 %v166_v8  ;;  %v909_v8 = vmov 2131351028  }
  0x3d   : > { %p849_p8 = por %p848_p5, %p847_p3 }
  0x3e   : > { %v142_v12 = vfloor.f32 %v140_v9  ;;  %v143_v13 = vmul.f32 16.0, %v141_v10  ;;  %v701_v14 = vadd.f32 -1.0, %v141_v10  ;;  %v170_v15 = vmul.f32 -4.6051702, %v167_v11 }
  0x3f   : > { %v149_v19 = vadd.f32 1.0, %v141_v10  ;;  %v168_v23 = vmul.f32 2.0, %v167_v11  ;;  %p850_p10 = pnand %p849_p8, %p843_p1 }
  0x40   : > { %v145_v16 = vsub.f32 %v136_v4, %v143_v13  ;;  %v171_v17 = vmul.f32 1.442695, %v170_v15  ;;  %v144_v18 = vmul.f32 16.0, %v142_v12  ;;  %v702_v24 = vadd.f32 -1.0, %v142_v12 }
  0x41   : > { %v169_v26 = vsub.f32 %v165_v5, %v168_v23  ;;  %v150_v27 = vadd.f32 1.0, %v142_v12  ;;  %v908_v5 = vmov 2475754826  }
  0x42   : > { %vm151_vm0 = vcmp.lt.f32.partialorder %v145_v16, 0.0  ;;  %vm147_vm1 = vcmp.ge.f32.partialorder %v145_v16, 16.0  ;;  %794 = vpow2.f32 %v171_v17  ;;  %v146_v21 = vsub.f32 %v1034_v6, %v144_v18 }
  0x43   : > { %v155_v20 = vsel %vm151_vm0, %v701_v14, %v141_v10  ;;  %v1038_v30 = vmul.f32 1.5707964, %v169_v26  ;;  %v910_v10 = vmov 2102212464  }
  0x44   : > { %v157_v22 = vsel %vm147_vm1, %v149_v19, %v155_v20  ;;  %vm152_vm2 = vcmp.lt.f32.partialorder %v146_v21, 0.0  ;;  %vm148_vm3 = vcmp.ge.f32.partialorder %v146_v21, 16.0  ;;  %v912_v20 = vmov 1326507024  }
  0x45   : > { %v159_v25 = vmul.f32 16.0, %v157_v22  ;;  %v156_v28 = vsel %vm152_vm2, %v702_v24, %v142_v12  ;;  %v911_v12 = vmov 920167782  }
  0x46   : > { %v158_v32 = vsel %vm148_vm3, %v150_v27, %v156_v28 }
  0x47   : > { %v161_v29 = vsub.f32 %v136_v4, %v159_v25  ;;  %v1063_v51 = vmul.f32 16.0, %v158_v32 }
  0x49   : > { %v162_v58 = vsub.f32 %v1034_v6, %v1063_v51 }
  0x4f   : > { %v1040_v31 = vpop.eup %794 }
  0x50   : > { %v174_v33 = vmul.f32 %v1040_v31, %v157_v22  ;;  %v175_v34 = vmul.f32 %v1040_v31, %v158_v32  ;;  %v386_v35 = vmul.f32 %v1040_v31, %v161_v29 }
  0x52   : > { %v1046_v36 = vadd.f32 %v174_v33, %v1038_v30  ;;  %v1049_v37 = vadd.f32 %v175_v34, %v1038_v30  ;;  %v1052_v38 = vadd.f32 %v386_v35, %v1038_v30 }
  0x54   : > { %v178_v39 = vand.u32 2147483647, %v1046_v36  ;;  %v181_v40 = vand.u32 2139095040, %v1046_v36  ;;  %v282_v41 = vand.u32 2147483647, %v1049_v37  ;;  %v285_v42 = vand.u32 2139095040, %v1049_v37 }
  0x55   : > { %v393_v47 = vand.u32 2139095040, %v1052_v38 }
  0x56   : > { %v182_v43 = vshrl.u32 %v181_v40, 23  ;;  %v185_v44 = vand.u32 8388607, %v178_v39  ;;  %v286_v45 = vshrl.u32 %v285_v42, 23  ;;  %v289_v46 = vand.u32 8388607, %v282_v41 }
  0x57   : > { %v394_v50 = vshrl.u32 %v393_v47, 23 }
  0x58   : > { %v703_v48 = vadd.s32 4294967169, %v182_v43  ;;  %v707_v49 = vadd.s32 4294967169, %v286_v45  ;;  %v186_v53 = vor.u32 8388608, %v185_v44  ;;  %v290_v54 = vor.u32 8388608, %v289_v46 }
  0x59   : > { %v711_v56 = vadd.s32 4294967169, %v394_v50 }
  0x5a   : > { %v188_v52 = vadd.s32 1, %v703_v48  ;;  %v292_v55 = vadd.s32 1, %v707_v49  ;;  %v1067_v62 = vshll.u32 %v186_v53, 8  ;;  %v1069_v0 = vshll.u32 %v290_v54, 8 }
  0x5b   : > { %v1071_v1 = vadd.s32 1, %v711_v56 }
  0x5c   : > { %vm189_vm4 = vcmp.gt.s32.totalorder %v188_v52, 0  ;;  %vm293_vm5 = vcmp.gt.s32.totalorder %v292_v55, 0 }
  0x5d   : > { %v190_v57 = vsel %vm189_vm4, %v188_v52, 0  ;;  %v294_v61 = vsel %vm293_vm5, %v292_v55, 0  ;;  %vm401_vm10 = vcmp.gt.s32.totalorder %v1071_v1, 0 }
  0x5e   : > { %v191_v59 = vshrl.u32 %v190_v57, 5  ;;  %v192_v60 = vand.u32 31, %v190_v57  ;;  %v296_v63 = vand.u32 31, %v294_v61  ;;  %v1078_v14 = vshrl.u32 %v294_v61, 5 }
  0x60   : > { %v193_v2 = vsub.s32 32, %v192_v60  ;;  %v195_v4 = vshll.u32 %v907_v3, %v192_v60  ;;  %v198_v7 = vshll.u32 %v908_v5, %v192_v60  ;;  %v201_v9 = vshll.u32 %v909_v8, %v192_v60 }
  0x61   : > { %v204_v11 = vshll.u32 %v910_v10, %v192_v60  ;;  %v207_v13 = vshll.u32 %v911_v12, %v192_v60  ;;  %vm210_vm6 = vcmp.lt.s32.totalorder %v191_v59, 1  ;;  %vm211_vm7 = vcmp.lt.s32.totalorder %v191_v59, 2 }
  0x62   : > { %v194_v15 = vshrl.u32 %v907_v3, %v193_v2  ;;  %v196_v16 = vshrl.u32 %v908_v5, %v193_v2  ;;  %v199_v17 = vshrl.u32 %v909_v8, %v193_v2  ;;  %v202_v18 = vshrl.u32 %v910_v10, %v193_v2 }
  0x63   : > { %v205_v19 = vshrl.u32 %v911_v12, %v193_v2  ;;  %v208_v21 = vshrl.u32 %v912_v20, %v193_v2  ;;  %vm213_vm8 = vcmp.lt.s32.totalorder %v191_v59, 4  ;;  %v297_v25 = vsub.s32 32, %v296_v63 }
  0x64   : > { %v197_v22 = vor.u32 %v196_v16, %v195_v4  ;;  %v200_v23 = vor.u32 %v199_v17, %v198_v7  ;;  %v203_v24 = vor.u32 %v202_v18, %v201_v9  ;;  %vm212_vm9 = vcmp.lt.s32.totalorder %v191_v59, 3 }
  0x65   : > { %v206_v26 = vor.u32 %v205_v19, %v204_v11  ;;  %v209_v27 = vor.u32 %v208_v21, %v207_v13  ;;  %v299_v28 = vshll.u32 %v907_v3, %v296_v63  ;;  %v302_v43 = vshll.u32 %v908_v5, %v296_v63 }
  0x66   : > { %v214_v29 = vsel %vm210_vm6, %v194_v15, %v197_v22  ;;  %v215_v32 = vsel %vm213_vm8, %v203_v24, 2102212464  ;;  %v218_v33 = vsel %vm210_vm6, %v197_v22, %v200_v23  ;;  %v222_v34 = vsel %vm210_vm6, %v200_v23, %v203_v24 }
  0x67   : > { %v216_v35 = vsel %vm212_vm9, %v200_v23, %v215_v32  ;;  %v219_v40 = vsel %vm213_vm8, %v206_v26, 920167782  ;;  %v223_v42 = vsel %vm213_vm8, %v209_v27, 1326507024  ;;  %v298_v46 = vshrl.u32 %v907_v3, %v297_v25 }
  0x68   : > { %v220_v44 = vsel %vm212_vm9, %v203_v24, %v219_v40  ;;  %v224_v45 = vsel %vm212_vm9, %v206_v26, %v223_v42  ;;  %v300_v47 = vshrl.u32 %v908_v5, %v297_v25  ;;  %v217_v48 = vsel %vm211_vm7, %v214_v29, %v216_v35 }
  0x69   : > { %v221_v49 = vsel %vm211_vm7, %v218_v33, %v220_v44  ;;  %v225_v50 = vsel %vm211_vm7, %v222_v34, %v224_v45  ;;  %v303_v52 = vshrl.u32 %v909_v8, %v297_v25  ;;  %v305_v61 = vshll.u32 %v909_v8, %v296_v63 }
  0x6a   : > { %v1099_v53 = vmul.u32.u64.low %v1067_v62, %v225_v50  ;;  %v1100_v54 = vmul.u32.u64.high %v1067_v62, %v225_v50, %v1099_v53  ;;  %v1103_v55 = vmul.u32.u64.low %v1067_v62, %v221_v49  ;;  %v1104_v56 = vmul.u32.u64.high %v1067_v62, %v221_v49, %v1103_v55 }
  0x6b   : > { %v301_v57 = vor.u32 %v300_v47, %v299_v28  ;;  %v304_v60 = vor.u32 %v303_v52, %v302_v43  ;;  %v306_v2 = vshrl.u32 %v910_v10, %v297_v25  ;;  %v308_v59 = vshll.u32 %v910_v10, %v296_v63 }
  0x6c   : > { %v309_v4 = vshrl.u32 %v911_v12, %v297_v25  ;;  %v311_v7 = vshll.u32 %v911_v12, %v296_v63  ;;  %v312_v9 = vshrl.u32 %v912_v20, %v297_v25  ;;  %v233_v11 = vmul.u32 %v1067_v62, %v217_v48 }
  0x6d   : > { %v307_v13 = vor.u32 %v306_v2, %v305_v61  ;;  %vm314_vm11 = vcmp.lt.s32.totalorder %v1078_v14, 1  ;;  %vm315_vm12 = vcmp.lt.s32.totalorder %v1078_v14, 2  ;;  %vm235_vm13 = vc.u32 %v1100_v54, %v1103_v55 }
  0x6e   : > { %v236_v15 = vadd.s32 1, %v1104_v56  ;;  %v310_v16 = vor.u32 %v309_v4, %v308_v59  ;;  %vm316_vm14 = vcmp.lt.s32.totalorder %v1078_v14, 3  ;;  %v313_v17 = vor.u32 %v312_v9, %v311_v7 }
  0x6f   : > { %vm317_vm15 = vcmp.lt.s32.totalorder %v1078_v14, 4  ;;  %v318_v63 = vsel %vm314_vm11, %v298_v46, %v301_v57  ;;  %v322_v18 = vsel %vm314_vm11, %v301_v57, %v304_v60  ;;  %v326_v22 = vsel %vm314_vm11, %v304_v60, %v307_v13 }
  0x70   : > { %v237_v62 = vsel %vm235_vm13, %v236_v15, %v1104_v56  ;;  %v319_v19 = vsel %vm317_vm15, %v307_v13, 2102212464  ;;  %v323_v21 = vsel %vm317_vm15, %v310_v16, 920167782  ;;  %v327_v26 = vsel %vm317_vm15, %v313_v17, 1326507024 }
  0x71   : > { %v238_v23 = vadd.s32 %v237_v62, %v233_v11  ;;  %v320_v24 = vsel %vm316_vm14, %v304_v60, %v319_v19  ;;  %v324_v25 = vsel %vm316_vm14, %v307_v13, %v323_v21  ;;  %v328_v28 = vsel %vm316_vm14, %v310_v16, %v327_v26 }
  0x72   : > { %v325_v27 = vsel %vm315_vm12, %v322_v18, %v324_v25  ;;  %v387_v29 = vmul.f32 %v1040_v31, %v162_v58  ;;  %v402_v32 = vsel %vm401_vm10, %v1071_v1, 0  ;;  %v321_v33 = vsel %vm315_vm12, %v318_v63, %v320_v24 }
  0x73   : > { %v329_v34 = vsel %vm315_vm12, %v326_v22, %v328_v28  ;;  %v1136_v35 = vmul.u32.u64.low %v1069_v0, %v325_v27  ;;  %v1137_v40 = vmul.u32.u64.high %v1069_v0, %v325_v27, %v1136_v35  ;;  %v239_v31 = vadd.s32 536870912, %v238_v23 }
  0x74   : > { %v1141_v42 = vmul.u32.u64.low %v1069_v0, %v329_v34  ;;  %v1142_v6 = vmul.u32.u64.high %v1069_v0, %v329_v34, %v1141_v42  ;;  %v404_v51 = vand.u32 31, %v402_v32  ;;  %v337_v58 = vmul.u32 %v1069_v0, %v321_v33 }
  0x75   : > { %v1146_v1 = vadd.f32 %v387_v29, %v1038_v30  ;;  %v390_v43 = vand.u32 2147483647, %v1052_v38  ;;  %v340_v14 = vadd.s32 1, %v1137_v40  ;;  %v1152_v45 = vshrl.u32 %v239_v31, 30 }
  0x76   : > { %v405_v44 = vsub.s32 32, %v404_v51  ;;  %vm339_vm0 = vc.u32 %v1142_v6, %v1136_v35  ;;  %v403_v0 = vshrl.u32 %v402_v32, 5  ;;  %v407_v49 = vshll.u32 %v907_v3, %v404_v51 }
  0x77   : > { %v341_v46 = vsel %vm339_vm0, %v340_v14, %v1137_v40  ;;  %v397_v48 = vand.u32 8388607, %v390_v43  ;;  %v497_v30 = vand.u32 2139095040, %v1146_v1  ;;  %v410_v52 = vshll.u32 %v908_v5, %v404_v51 }
  0x78   : > { %v342_v47 = vadd.s32 %v341_v46, %v337_v58  ;;  %v408_v50 = vshrl.u32 %v908_v5, %v405_v44  ;;  %v411_v53 = vshrl.u32 %v909_v8, %v405_v44  ;;  %v413_v57 = vshll.u32 %v909_v8, %v404_v51 }
  0x79   : > { %v414_v60 = vshrl.u32 %v910_v10, %v405_v44  ;;  %v416_v61 = vshll.u32 %v910_v10, %v404_v51  ;;  %v241_v2 = vshll.u32 %v1152_v45, 30  ;;  %v417_v59 = vshrl.u32 %v911_v12, %v405_v44 }
  0x7a   : > { %v343_v56 = vadd.s32 536870912, %v342_v47  ;;  %v419_v7 = vshll.u32 %v911_v12, %v404_v51  ;;  %v420_v9 = vshrl.u32 %v912_v20, %v405_v44  ;;  %v398_v11 = vor.u32 8388608, %v397_v48 }
  0x7b   : > { %v409_v13 = vor.u32 %v408_v50, %v407_v49  ;;  %vm425_vm1 = vcmp.lt.s32.totalorder %v403_v0, 4  ;;  %v498_v15 = vshrl.u32 %v497_v30, 23  ;;  %v412_v17 = vor.u32 %v411_v53, %v410_v52 }
  0x7c   : > { %v1167_v4 = vshrl.u32 %v343_v56, 30  ;;  %v415_v63 = vor.u32 %v414_v60, %v413_v57  ;;  %v418_v18 = vor.u32 %v417_v59, %v416_v61  ;;  %v1172_v62 = vsub.s32 %v238_v23, %v241_v2 }
  0x7d   : > { %v421_v19 = vor.u32 %v420_v9, %v419_v7  ;;  %vm422_vm2 = vcmp.lt.s32.totalorder %v403_v0, 1  ;;  %vm424_vm3 = vcmp.lt.s32.totalorder %v403_v0, 3  ;;  %v406_v21 = vshrl.u32 %v907_v3, %v405_v44 }
  0x7e   : > { %v345_v16 = vshll.u32 %v1167_v4, 30  ;;  %v431_v22 = vsel %vm425_vm1, %v418_v18, 920167782  ;;  %vm423_vm4 = vcmp.lt.s32.totalorder %v403_v0, 2  ;;  %v427_v24 = vsel %vm425_vm1, %v415_v63, 2102212464 }
  0x7f   : > { %v715_v25 = vadd.s32 4294967169, %v498_v15  ;;  %v430_v27 = vsel %vm422_vm2, %v409_v13, %v412_v17  ;;  %v432_v28 = vsel %vm424_vm3, %v415_v63, %v431_v22  ;;  %v434_v29 = vsel %vm422_vm2, %v412_v17, %v415_v63 }
  0x80   : > { %v1177_v26 = vsub.s32 %v342_v47, %v345_v16  ;;  %v244_v32 = vsub.s32 0, %v1172_v62  ;;  %v435_v23 = vsel %vm425_vm1, %v421_v19, 1326507024  ;;  %v438_v33 = vshll.u32 %v398_v11, 8 }
  0x81   : > { %v426_v34 = vsel %vm422_vm2, %v406_v21, %v409_v13  ;;  %v436_v40 = vsel %vm424_vm3, %v418_v18, %v435_v23  ;;  %v428_v42 = vsel %vm424_vm3, %v412_v17, %v427_v24  ;;  %v433_v31 = vsel %vm423_vm4, %v430_v27, %v432_v28 }
  0x82   : > { %v437_v51 = vsel %vm423_vm4, %v434_v29, %v436_v40  ;;  %v504_v58 = vadd.s32 1, %v715_v25  ;;  %v348_v14 = vsub.s32 0, %v1177_v26  ;;  %v704_v44 = vmin.u32 %v244_v32, %v1172_v62 }
  0x83   : > { %v1185_v46 = vmul.u32.u64.low %v438_v33, %v437_v51  ;;  %v1186_v47 = vmul.u32.u64.high %v438_v33, %v437_v51, %v1185_v46  ;;  %v429_v48 = vsel %vm423_vm4, %v426_v34, %v428_v42  ;;  %v494_v53 = vand.u32 2147483647, %v1146_v1 }
  0x84   : > { %v1189_v30 = vmul.u32.u64.low %v438_v33, %v433_v31  ;;  %v1190_v49 = vmul.u32.u64.high %v438_v33, %v433_v31, %v1189_v30  ;;  %vm505_vm5 = vcmp.gt.s32.totalorder %v504_v58, 0  ;;  %v708_v52 = vmin.u32 %v348_v14, %v1177_v26 }
  0x85   : > { %v506_v50 = vsel %vm505_vm5, %v504_v58, 0  ;;  %v246_v57 = vclz %v704_v44  ;;  %v445_v60 = vmul.u32 %v438_v33, %v429_v48  ;;  %v501_v7 = vand.u32 8388607, %v494_v53 }
  0x86   : > { %v508_v56 = vand.u32 31, %v506_v50  ;;  %vm447_vm6 = vc.u32 %v1186_v47, %v1189_v30  ;;  %v448_v61 = vadd.s32 1, %v1190_v49  ;;  %v350_v2 = vclz %v708_v52 }
  0x87   : > { %v705_v9 = vadd.s32 4294967294, %v246_v57  ;;  %v507_v18 = vshrl.u32 %v506_v50, 5  ;;  %v502_v22 = vor.u32 8388608, %v501_v7  ;;  %v234_v46 = vadd.s32 %v1103_v55, %v1100_v54 }
  0x88   : > { %v509_v0 = vsub.s32 32, %v508_v56  ;;  %v449_v59 = vsel %vm447_vm6, %v448_v61, %v1190_v49  ;;  %v511_v13 = vshll.u32 %v907_v3, %v508_v56  ;;  %v514_v16 = vshll.u32 %v908_v5, %v508_v56 }
  0x89   : > { %v450_v11 = vadd.s32 %v449_v59, %v445_v60  ;;  %v520_v19 = vshll.u32 %v910_v10, %v508_v56  ;;  %v709_v21 = vadd.s32 4294967294, %v350_v2  ;;  %v517_v24 = vshll.u32 %v909_v8, %v508_v56 }
  0x8a   : > { %v512_v15 = vshrl.u32 %v908_v5, %v509_v0  ;;  %v515_v17 = vshrl.u32 %v909_v8, %v509_v0  ;;  %v518_v25 = vshrl.u32 %v910_v10, %v509_v0  ;;  %vm706_vm7 = vcmp.lt.s32.totalorder %v705_v9, 0 }
  0x8b   : > { %v451_v63 = vadd.s32 536870912, %v450_v11  ;;  %v521_v28 = vshrl.u32 %v911_v12, %v509_v0  ;;  %v523_v5 = vshll.u32 %v911_v12, %v508_v56  ;;  %v524_v23 = vshrl.u32 %v912_v20, %v509_v0 }
  0x8c   : > { %v513_v29 = vor.u32 %v512_v15, %v511_v13  ;;  %v516_v32 = vor.u32 %v515_v17, %v514_v16  ;;  %vm526_vm8 = vcmp.lt.s32.totalorder %v507_v18, 1  ;;  %v249_v40 = vsel %vm706_vm7, 0, %v705_v9 }
  0x8d   : > { %v1208_v27 = vshrl.u32 %v451_v63, 30  ;;  %v522_v34 = vor.u32 %v521_v28, %v520_v19  ;;  %vm710_vm9 = vcmp.lt.s32.totalorder %v709_v21, 0  ;;  %v519_v8 = vor.u32 %v518_v25, %v517_v24 }
  0x8e   : > { %v542_v42 = vshll.u32 %v502_v22, 8  ;;  %v510_v31 = vshrl.u32 %v907_v3, %v509_v0  ;;  %vm528_vm10 = vcmp.lt.s32.totalorder %v507_v18, 3  ;;  %vm529_vm11 = vcmp.lt.s32.totalorder %v507_v18, 4 }
  0x8f   : > { %v453_v33 = vshll.u32 %v1208_v27, 30  ;;  %v525_v51 = vor.u32 %v524_v23, %v523_v5  ;;  %vm527_vm12 = vcmp.lt.s32.totalorder %v507_v18, 2  ;;  %v531_v58 = vsel %vm529_vm11, %v519_v8, 2102212464 }
  0x90   : > { %v534_v12 = vsel %vm526_vm8, %v513_v29, %v516_v32  ;;  %v254_v20 = vsub.s32 4294967266, %v249_v40  ;;  %v535_v44 = vsel %vm529_vm11, %v522_v34, 920167782  ;;  %v250_v48 = vsub.s32 32, %v249_v40 }
  0x91   : > { %v454_v10 = vsub.s32 %v450_v11, %v453_v33  ;;  %v353_v49 = vsel %vm710_vm9, 0, %v709_v21  ;;  %v536_v3 = vsel %vm528_vm10, %v519_v8, %v535_v44  ;;  %v530_v52 = vsel %vm526_vm8, %v510_v31, %v513_v29 }
  0x92   : > { %v532_v56 = vsel %vm528_vm10, %v516_v32, %v531_v58  ;;  %v537_v57 = vsel %vm527_vm12, %v534_v12, %v536_v3  ;;  %v538_v60 = vsel %vm526_vm8, %v516_v32, %v519_v8  ;;  %v539_v61 = vsel %vm529_vm11, %v525_v51, 1326507024 }
  0x93   : > { %v456_v14 = vsub.s32 0, %v454_v10  ;;  %v1227_v0 = vmul.u32.u64.low %v542_v42, %v537_v57  ;;  %v1228_v2 = vmul.u32.u64.high %v542_v42, %v537_v57, %v1227_v0  ;;  %v255_v54 = vadd.s32 127, %v254_v20 }
  0x94   : > { %v358_v59 = vsub.s32 4294967266, %v353_v49  ;;  %v540_v7 = vsel %vm528_vm10, %v522_v34, %v539_v61  ;;  %v338_v9 = vadd.s32 %v1136_v35, %v1142_v6  ;;  %v533_v13 = vsel %vm527_vm12, %v530_v52, %v532_v56 }
  0x95   : > { %v712_v50 = vmin.u32 %v456_v14, %v454_v10  ;;  %v541_v15 = vsel %vm527_vm12, %v538_v60, %v540_v7  ;;  %v251_v16 = vshll.u32 %v1172_v62, %v249_v40  ;;  %v252_v17 = vshrl.u32 %v234_v46, %v250_v48 }
  0x96   : > { %v1237_v63 = vmul.u32.u64.low %v542_v42, %v541_v15  ;;  %v1238_v19 = vmul.u32.u64.high %v542_v42, %v541_v15, %v1237_v63  ;;  %v256_v21 = vshll.u32 %v255_v54, 23  ;;  %v446_v22 = vadd.s32 %v1189_v30, %v1186_v47 }
  0x97   : > { %v458_v55 = vclz %v712_v50  ;;  %v552_v24 = vadd.s32 1, %v1228_v2  ;;  %v354_v25 = vsub.s32 32, %v353_v49  ;;  %v359_v35 = vadd.s32 127, %v358_v59 }
  0x98   : > { %v549_v28 = vmul.u32 %v542_v42, %v533_v13  ;;  %v253_v32 = vor.u32 %v252_v17, %v251_v16  ;;  %vm551_vm14 = vc.u32 %v1238_v19, %v1227_v0  ;;  %v257_v62 = vor.u32 4788187, %v256_v21 }
  0x99   : > { %v713_v11 = vadd.s32 4294967294, %v458_v55  ;;  %v553_v34 = vsel %vm551_vm14, %v552_v24, %v1228_v2  ;;  %v355_v47 = vshll.u32 %v1177_v26, %v353_v49  ;;  %v356_v30 = vshrl.u32 %v338_v9, %v354_v25 }
  0x9a   : > { %v360_v40 = vshll.u32 %v359_v35, 23  ;;  %v554_v8 = vadd.s32 %v553_v34, %v549_v28  ;;  %v260_v58 = vcvt.s32.f32 %v253_v32  ;;  %v258_v20 = vand.u32 2147483647, %v257_v62 }
  0x9b   : > { %vm714_vm13 = vcmp.lt.s32.totalorder %v713_v11, 0  ;;  %vm180_vm15 = vcmp.lt.s32.totalorder %v1046_v36, 0  ;;  %vm392_vm0 = vcmp.lt.s32.totalorder %v1052_v38, 0  ;;  %vm1254_vm1 = vcmp.le.f32.partialorder %v178_v39, 0.7853982 }
  0x9c   : > { %v461_v6 = vsel %vm714_vm13, 0, %v713_v11  ;;  %v555_v42 = vadd.s32 536870912, %v554_v8  ;;  %v361_v14 = vor.u32 4788187, %v360_v40  ;;  %v261_v50 = vmul.f32 %v260_v58, %v258_v20 }
  0x9d   : > { %v462_v29 = vsub.s32 32, %v461_v6  ;;  %v466_v18 = vsub.s32 4294967266, %v461_v6  ;;  %v463_v5 = vshll.u32 %v454_v10, %v461_v6  ;;  %v357_v10 = vor.u32 %v356_v30, %v355_v47 }
  0x9e   : > { %v1247_v44 = vshrl.u32 %v555_v42, 30  ;;  %v362_v52 = vand.u32 2147483647, %v361_v14  ;;  %v262_v60 = vxor.u32 2147483648, %v261_v50  ;;  %vm284_vm2 = vcmp.lt.s32.totalorder %v1049_v37, 0 }
  0x9f   : > { %v464_v23 = vshrl.u32 %v446_v22, %v462_v29  ;;  %v467_v33 = vadd.s32 127, %v466_v18  ;;  %v364_v26 = vcvt.s32.f32 %v357_v10  ;;  %vm1263_vm3 = vcmp.le.f32.partialorder %v390_v43, 0.7853982 }
  0xa0   : > { %v557_v3 = vshll.u32 %v1247_v44, 30  ;;  %v263_v7 = vsel %vm180_vm15, %v262_v60, %v261_v50  ;;  %v550_v39 = vadd.s32 %v1227_v0, %v1238_v19  ;;  %vm1276_vm5 = vcmp.le.f32.partialorder %v282_v41, 0.7853982 }
  0xa1   : > { %v468_v31 = vshll.u32 %v467_v33, 23  ;;  %v465_v51 = vor.u32 %v464_v23, %v463_v5  ;;  %v365_v61 = vmul.f32 %v364_v26, %v362_v52  ;;  %v266_v16 = vsel %vm1254_vm1, %v1046_v36, %v263_v7 }
  0xa2   : > { %v558_v49 = vsub.s32 %v554_v8, %v557_v3  ;;  %v264_v0 = vsub.s32 4, %v1152_v45  ;;  %796 = vcosq.f32 %v266_v16  ;;  %v476_v6 = vsub.s32 4, %v1208_v27 }
  0xa3   : > { %v469_v12 = vor.u32 4788187, %v468_v31  ;;  %v472_v48 = vcvt.s32.f32 %v465_v51  ;;  %v366_v9 = vxor.u32 2147483648, %v365_v61  ;;  %798 = vsinq.f32 %v266_v16 }
  0xa4   : > { %v560_v57 = vsub.s32 0, %v558_v49  ;;  %v265_v18 = vsel %vm180_vm15, %v264_v0, %v1152_v45  ;;  %v368_v32 = vsub.s32 4, %v1167_v4  ;;  %v477_v23 = vsel %vm392_vm0, %v476_v6, %v1208_v27  ;;  %v600_v6 = vld [vmem:[%s1028_s24] sm:$0xff] }
  0xa5   : > { %v470_v46 = vand.u32 2147483647, %v469_v12  ;;  %v367_v63 = vsel %vm284_vm2, %v366_v9, %v365_v61  ;;  %v267_v34 = vsel %vm1254_vm1, 0, %v265_v18  ;;  %v479_v30 = vsel %vm1263_vm3, 0, %v477_v23 }
  0xa6   : > { %v716_v2 = vmin.u32 %v560_v57, %v558_v49  ;;  %v370_v41 = vsel %vm1276_vm5, %v1049_v37, %v367_v63  ;;  %v369_v47 = vsel %vm284_vm2, %v368_v32, %v1167_v4  ;;  %vm496_vm6 = vcmp.lt.s32.totalorder %v1146_v1, 0 }
  0xa7   : > { %v473_v56 = vmul.f32 %v472_v48, %v470_v46  ;;  %v580_v40 = vsub.s32 4, %v1247_v44  ;;  %v271_v8 = vadd.s32 3, %v267_v34  ;;  %vm1308_vm7 = vcmp.le.f32.partialorder %v494_v53, 0.7853982 }
  0xa8   : > { %v562_v55 = vclz %v716_v2  ;;  %v371_v51 = vsel %vm1276_vm5, 0, %v369_v47  ;;  %v483_v4 = vadd.s32 3, %v479_v30  ;;  %vm270_vm1 = vweird.f32 %v1046_v36 }
  0xa9   : > { %v474_v54 = vxor.u32 2147483648, %v473_v56  ;;  %v581_v12 = vsel %vm496_vm6, %v580_v40, %v1247_v44  ;;  %v272_v14 = vand.u32 3, %v271_v8  ;;  %v375_v46 = vadd.s32 3, %v371_v51 }
  0xaa   : > { %v717_v11 = vadd.s32 4294967294, %v562_v55  ;;  %v484_v3 = vand.u32 3, %v483_v4  ;;  %v583_v50 = vsel %vm1308_vm7, 0, %v581_v12  ;;  %vm482_vm2 = vweird.f32 %v1052_v38 }
  0xab   : > { %v475_v15 = vsel %vm392_vm0, %v474_v54, %v473_v56  ;;  %vm277_vm8 = vcmp.eq.s32.totalorder %v272_v14, 2  ;;  %v376_v44 = vand.u32 3, %v375_v46  ;;  %v587_v61 = vadd.s32 3, %v583_v50 }
  0xac   : > { %vm718_vm4 = vcmp.lt.s32.totalorder %v717_v11, 0  ;;  %v478_v19 = vsel %vm1263_vm3, %v1052_v38, %v475_v15  ;;  %vm274_vm9 = vcmp.eq.s32.totalorder %v272_v14, 0  ;;  %vm486_vm10 = vcmp.eq.s32.totalorder %v484_v3, 0 }
  0xad   : > { %v565_v43 = vsel %vm718_vm4, 0, %v717_v11  ;;  %800 = vcosq.f32 %v478_v19  ;;  %vm489_vm11 = vcmp.eq.s32.totalorder %v484_v3, 2  ;;  %vm273_vm12 = vcmp.lt.s32.totalorder %v272_v14, 2 }
  0xae   : > { %v566_v21 = vsub.s32 32, %v565_v43  ;;  %v567_v22 = vshll.u32 %v558_v49, %v565_v43  ;;  %v570_v24 = vsub.s32 4294967266, %v565_v43  ;;  %802 = vsinq.f32 %v478_v19 }
  0xaf   : > { %804 = vcosq.f32 %v370_v41  ;;  %v797_v58 = vpop.eup %796  ;;  %vm378_vm13 = vcmp.eq.s32.totalorder %v376_v44, 0  ;;  %vm381_vm14 = vcmp.eq.s32.totalorder %v376_v44, 2  ;;  %vm485_vm15 = vcmp.lt.s32.totalorder %v484_v3, 2 }
  0xb0   : > { %v568_v25 = vshrl.u32 %v550_v39, %v566_v21  ;;  %v571_v35 = vadd.s32 127, %v570_v24  ;;  %806 = vsinq.f32 %v370_v41  ;;  %v799_v10 = vpop.eup %798  ;;  %v278_v49 = vxor.u32 2147483648, %v797_v58 }
  0xb1   : > { %v275_v56 = vxor.u32 2147483648, %v799_v10  ;;  %v588_v11 = vand.u32 3, %v587_v61  ;;  %vm377_vm0 = vcmp.lt.s32.totalorder %v376_v44, 2  ;;  %vm374_vm4 = vweird.f32 %v1049_v37 }
  0xb2   : > { %v569_v28 = vor.u32 %v568_v25, %v567_v22  ;;  %v572_v29 = vshll.u32 %v571_v35, 23  ;;  %v279_v55 = vsel %vm277_vm8, %v278_v49, %v799_v10 }
  0xb3   : > { %v276_v59 = vsel %vm274_vm9, %v797_v58, %v275_v56  ;;  %vm593_vm3 = vcmp.eq.s32.totalorder %v588_v11, 2  ;;  %vm590_vm5 = vcmp.eq.s32.totalorder %v588_v11, 0 }
  0xb4   : > { %v573_v5 = vor.u32 4788187, %v572_v29  ;;  %v576_v62 = vcvt.s32.f32 %v569_v28  ;;  %v280_v39 = vsel %vm273_vm12, %v276_v59, %v279_v55 }
  0xb5   : > { %v281_v22 = vsel %vm270_vm1, nan, %v280_v39 }
  0xb6   : > { %v574_v33 = vand.u32 2147483647, %v573_v5 }
  0xb8   : > { %v577_v45 = vmul.f32 %v576_v62, %v574_v33 }
  0xba   : > { %v578_v31 = vxor.u32 2147483648, %v577_v45  ;;  %v801_v53 = vpop.eup %800 }
  0xbb   : > { %v803_v48 = vpop.eup %802  ;;  %v490_v60 = vxor.u32 2147483648, %v801_v53 }
  0xbc   : > { %v579_v42 = vsel %vm496_vm6, %v578_v31, %v577_v45  ;;  %v805_v52 = vpop.eup %804  ;;  %v487_v57 = vxor.u32 2147483648, %v803_v48  ;;  %vm589_vm6 = vcmp.lt.s32.totalorder %v588_v11, 2 }
  0xbd   : > { %v582_v20 = vsel %vm1308_vm7, %v1146_v1, %v579_v42  ;;  %v807_v26 = vpop.eup %806  ;;  %v382_v54 = vxor.u32 2147483648, %v805_v52  ;;  %v491_v9 = vsel %vm489_vm11, %v490_v60, %v803_v48  ;;  %vm586_vm7 = vweird.f32 %v1146_v1 }
  0xbe   : > { %808 = vcosq.f32 %v582_v20  ;;  %v379_v2 = vxor.u32 2147483648, %v807_v26  ;;  %v488_v7 = vsel %vm486_vm10, %v801_v53, %v487_v57 }
  0xbf   : > { %810 = vsinq.f32 %v582_v20  ;;  %v383_v15 = vsel %vm381_vm14, %v382_v54, %v807_v26  ;;  %v492_v16 = vsel %vm485_vm15, %v488_v7, %v491_v9 }
  0xc0   : > { %v380_v13 = vsel %vm378_vm13, %v805_v52, %v379_v2  ;;  %v493_v24 = vsel %vm482_vm2, nan, %v492_v16 }
  0xc1   : > { %v384_v63 = vsel %vm377_vm0, %v380_v13, %v383_v15  ;;  %v598_v35 = vadd.f32 %v493_v24, %v281_v22 }
  0xc2   : > { %v385_v38 = vsel %vm374_vm4, nan, %v384_v63 }
  0xcb   : > { %v809_v17 = vpop.eup %808 }
  0xcc   : > { %v811_v43 = vpop.eup %810  ;;  %v594_v21 = vxor.u32 2147483648, %v809_v17 }
  0xcd   : > { %v591_v0 = vxor.u32 2147483648, %v811_v43 }
  0xce   : > { %v595_v36 = vsel %vm593_vm3, %v594_v21, %v811_v43 }
  0xcf   : > { %v592_v19 = vsel %vm590_vm5, %v809_v17, %v591_v0 }
  0xd0   : > { %v596_v25 = vsel %vm589_vm6, %v592_v19, %v595_v36 }
  0xd1   : > { %v597_v37 = vsel %vm586_vm7, nan, %v596_v25 }
  0xd2   : > { %v599_v41 = vadd.f32 %v597_v37, %v385_v38 }
  0xd4   : > { %v603_v28 = vcombine.low %v598_v35, %v599_v41 }
  0xd6   : > { %v605_v29 = vadd.f32 %v603_v28, %v600_v6 }
  0xd8   : > { %606 = vst [vmem:[%s132_s25] sm:$0xff] %v605_v29 }
  0xd9   : > { %853 = shalt.err (!%p850_p10)
}
  0xda   : > { %s854_s5 = scalar_lea.hbm %s620_s29, 128  ;;  %s858_s14 = scalar_lea.hbm %s1363_s1, 256 }
  0xdb   : > { %p855_p2 = scmp.ne.s32.totalorder %s620_s29, %s854_s5  ;;  %p859_p7 = scmp.lt.s32.totalorder %s620_s29, %s1363_s1 }
  0xdc   : > { %p860_p0 = scmp.lt.s32.totalorder %s858_s14, %s854_s5 }
  0xdd   : > { %p856_p4 = pnand %p855_p2, %p1382_p12 }
  0xde   : > { %p861_p6 = por %p860_p0, %p859_p7 }
  0xdf   : > { %p857_p9 = pneg %p856_p4 }
  0xe1   : > { %p862_p11 = pnand %p861_p6, %p857_p9 }
  0xe3   : > { %865 = shalt.err (!%p862_p11)
}
  0xe4   : > { %744 = dma.vmem_to_hbm [thread:$0]  (%p1382_p12), %s623_s26, 128, %s620_s29, %s608_s30  }
  0xe5 PF: > { %s634_s21 = sand.u32 1, %s892_s6   ;;  %p1383_p13 = scmp.ne.s32.totalorder %s1369_s19, 0 }
  0xe6   : > { %p1384_p1 = scmp.ge.s32.totalorder %s904_s9, 2  ;;  %s635_s22 = scalar_lea.sflag [#allocation4], %s634_s21 }
  0xe8   : > { %p751_p3 = pnand %p1384_p1, %p1383_p13 }
  0xea   : > { %p752_p5 = pneg %p751_p3 }
  0xec   : > { %887 = dma.done.wait (%p752_p5), %s635_s22, 128  }
  0xed   : > { %889 = vsyncadd (%p752_p5), %s635_s22, 4294967168  ;;  %p14_p8 = scmp.ge.s32.totalorder %s949_s12, 4   ;;  %s1385_s6 = smov %s896_s7 }
  0xee   : > { %s1386_s7 = smov %s900_s8  ;;  %s1387_s8 = smov %s961_s15 }
  0xef   : > { %s1388_s9 = smov %s949_s12  ;;  %16 = sbr.rel (!%p14_p8) target bundleno = 5 (0x5), region = 69 }
  0xf4   :  { %640 = vsyncpa [#allocation3], 1 }
  0xf5   :  { %642 = vsyncpa [#allocation3 + $0x1], 1 }
  0xf6   :  { %643 = vsyncpa [#allocation4], 1 }
  0xf7   :  { %645 = vsyncpa [#allocation4 + $0x1], 1 }

</bundles_post_ra>
